<compile_context>
chip_gen: v6e
topology: v6e:2x2x1
jax: 0.10.0
libtpu: 0.0.40
codegen_flags: <defaults>
</compile_context>

<pallas_src>
import jax
import jax.numpy as jnp
from jax.experimental import pallas as pl
from jax.experimental.pallas import tpu as pltpu


def block_chain_kernel(z_ref, lout_ref, wv_ref, w1_ref, b1_ref, w2_ref, b2_ref,
                       out_ref):
    """One batch tile through L chained Blocks (L = leading dim of weight refs)."""
    num_layers = wv_ref.shape[0]  # static Python int -> unrolled loop
    prev = None                   # carried activation; layer 0 reads lout_ref directly
    for layer in range(num_layers):
        # l1 = v(z) + w1(lOut) + (bv + b1)   -- two dots straight from VMEM refs.
        l1 = (jnp.dot(z_ref[...], wv_ref[layer],
                      preferred_element_type=jnp.float32)
              + jnp.dot(lout_ref[...] if prev is None else prev, w1_ref[layer],
                        preferred_element_type=jnp.float32)
              + b1_ref[layer])
        a1 = jnp.maximum(l1, 0.0)
        # l2 = w2(a1) + b2 + lOut   (lOut re-read at the residual, not kept live).
        l2 = (jnp.dot(a1, w2_ref[layer], preferred_element_type=jnp.float32)
              + b2_ref[layer]
              + (lout_ref[...] if prev is None else prev))
        prev = jnp.maximum(l2, 0.0)
    out_ref[...] = prev.astype(out_ref.dtype)


def _choose_batch_tiling(B):
    """Return (padded_B, tile_rows).

    Prefer ~512-row tiles: big enough to amortize the ~0.35us per-grid-step
    overhead, small enough that B=2048 still yields >=4 steps (pipelining and
    v7x megacore balance).  Never produce a single whole-batch tile for large
    ragged B (VMEM blow-up on v7x); pad the batch instead.
    """
    if B <= 512:
        tb = ((B + 7) // 8) * 8          # one tile, padded to a sublane multiple
        return tb, tb
    for c in (512, 256, 128, 64):
        if B % c == 0:
            return B, c
    return ((B + 511) // 512) * 512, 512  # ragged large batch: pad, slice later


def block_chain_forward(lOut, z, layers):
    """Run `len(layers)` chained Blocks in a single pallas_call.

    layers: list of (Wv, bv, W1, b1, W2, b2); Wv:(dZ,dOut), W1:(dLOut,dOut),
            W2:(dOut,dOut), biases (dOut,) or (1,dOut).  Output of block k feeds
            the lOut input of block k+1; z is shared by all blocks.
    """
    B, dLOut = lOut.shape
    Bz, dZ = z.shape
    assert Bz == B
    L = len(layers)
    dOut = layers[0][0].shape[1]
    assert dLOut == dOut, "residual `w2(a1) + lOut` requires dLOut == dOut"

    # Stack per-layer params along a leading layer axis; fold bv+b1 into one bias.
    Wv_all = jnp.stack([Wv for (Wv, bv, W1, b1, W2, b2) in layers])           # (L,dZ,dOut)
    W1_all = jnp.stack([W1 for (Wv, bv, W1, b1, W2, b2) in layers])           # (L,dLOut,dOut)
    W2_all = jnp.stack([W2 for (Wv, bv, W1, b1, W2, b2) in layers])           # (L,dOut,dOut)
    b1_all = jnp.stack([(bv.reshape(-1) + b1.reshape(-1)).reshape(1, dOut)
                        for (Wv, bv, W1, b1, W2, b2) in layers])              # (L,1,dOut)
    b2_all = jnp.stack([b2.reshape(-1).reshape(1, dOut)
                        for (Wv, bv, W1, b1, W2, b2) in layers])              # (L,1,dOut)

    Bp, tb = _choose_batch_tiling(B)
    if Bp != B:
        lOut = jnp.pad(lOut, ((0, Bp - B), (0, 0)))
        z = jnp.pad(z, ((0, Bp - B), (0, 0)))
    grid = (Bp // tb,)

    grid_spec = pltpu.PrefetchScalarGridSpec(
        num_scalar_prefetch=0,
        grid=grid,
        in_specs=[
            pl.BlockSpec((tb, dZ), lambda i: (i, 0)),              # z, streamed
            pl.BlockSpec((tb, dLOut), lambda i: (i, 0)),           # lOut, streamed
            pl.BlockSpec((L, dZ, dOut), lambda i: (0, 0, 0)),      # Wv stack, resident
            pl.BlockSpec((L, dLOut, dOut), lambda i: (0, 0, 0)),   # W1 stack, resident
            pl.BlockSpec((L, 1, dOut), lambda i: (0, 0, 0)),       # bv+b1 stack, resident
            pl.BlockSpec((L, dOut, dOut), lambda i: (0, 0, 0)),    # W2 stack, resident
            pl.BlockSpec((L, 1, dOut), lambda i: (0, 0, 0)),       # b2 stack, resident
        ],
        out_specs=pl.BlockSpec((tb, dOut), lambda i: (i, 0)),
    )

    flops = L * 2 * Bp * dOut * (dZ + dLOut + dOut)
    bytes_accessed = 4 * (Bp * (dZ + dLOut + dOut)
                          + L * (dZ * dOut + dLOut * dOut + dOut * dOut + 2 * dOut))

    out = pl.pallas_call(
        block_chain_kernel,
        out_shape=jax.ShapeDtypeStruct((Bp, dOut), jnp.float32),
        grid_spec=grid_spec,
        compiler_params=pltpu.CompilerParams(
            dimension_semantics=("parallel",)),
        cost_estimate=pl.CostEstimate(
            flops=flops, transcendentals=0, bytes_accessed=bytes_accessed),
    )(z, lOut, Wv_all, W1_all, b1_all, W2_all, b2_all)

    return out[:B] if Bp != B else out


def block_forward(lOut, z, Wv, bv, W1, b1, W2, b2):
    """Single Block forward — exactly the PyTorch module's semantics (L=1 chain)."""
    return block_chain_forward(lOut, z, [(Wv, bv, W1, b1, W2, b2)])


def block_ref(lOut, z, Wv, bv, W1, b1, W2, b2):
    l1 = z @ Wv + bv.reshape(1, -1) + lOut @ W1 + b1.reshape(1, -1)
    a1 = jnp.maximum(l1, 0.0)
    l2 = a1 @ W2 + b2.reshape(1, -1) + lOut
    return jnp.maximum(l2, 0.0)


def init_linear(key, d_in, d_out):
    # Mimic PyTorch's default Linear init: U(-1/sqrt(fan_in), 1/sqrt(fan_in)).
    kw, kb = jax.random.split(key)
    bound = 1.0 / jnp.sqrt(jnp.float32(d_in))
    W = jax.random.uniform(kw, (d_in, d_out), jnp.float32, -bound, bound)
    b = jax.random.uniform(kb, (d_out,), jnp.float32, -bound, bound)
    return W, b


if __name__ == "__main__":
    # dZ = 5*5*9 + 1 = 226 (from the module file); dLOut == dOut so the residual
    # add `w2(a1) + lOut` is shape-consistent, as the module requires.
    dZ, dLOut, dOut = 5 * 5 * 9 + 1, 32, 32
    B = 64  # small batch -> one (64, dZ) tile, grid=(1,)

    key = jax.random.PRNGKey(0)
    k_lout, k_z, k_b0, k_b1, k_b2 = jax.random.split(key, 5)

    lOut = jax.random.normal(k_lout, (B, dLOut), jnp.float32)
    z = jax.random.normal(k_z, (B, dZ), jnp.float32)

    layers = []
    for lk in (k_b0, k_b1, k_b2):
        kv, kw1, kw2 = jax.random.split(lk, 3)
        Wv, bv = init_linear(kv, dZ, dOut)
        W1, b1 = init_linear(kw1, dLOut, dOut)
        W2, b2 = init_linear(kw2, dOut, dOut)
        layers.append((Wv, bv, W1, b1, W2, b2))

    # --- single Block: matches the PyTorch module's forward -------------------
    Wv, bv, W1, b1, W2, b2 = layers[0]
    out1 = jax.block_until_ready(block_forward(lOut, z, Wv, bv, W1, b1, W2, b2))
    ref1 = block_ref(lOut, z, Wv, bv, W1, b1, W2, b2)
    assert out1.shape == (B, dOut)
    assert jnp.allclose(out1, ref1, atol=2e-4, rtol=2e-4), \
        float(jnp.max(jnp.abs(out1 - ref1)))

    # --- fused 3-Block chain: one pallas_call, activations never leave VMEM ---
    out3 = jax.block_until_ready(block_chain_forward(lOut, z, layers))
    ref3 = lOut
    for (Wv, bv, W1, b1, W2, b2) in layers:
        ref3 = block_ref(ref3, z, Wv, bv, W1, b1, W2, b2)
    assert out3.shape == (B, dOut)
    assert jnp.allclose(out3, ref3, atol=1e-3, rtol=1e-3), \
        float(jnp.max(jnp.abs(out3 - ref3)))

    print("KERNEL_OK")
</pallas_src>

<mosaic_0001>
module attributes {stable_mosaic.version = 11 : i64} {
  func.func @block_chain_kernel(%arg0: i32, %arg1: memref<64x226xf32, #tpu.memory_space<vmem>>, %arg2: memref<64x32xf32, #tpu.memory_space<vmem>>, %arg3: memref<1x226x32xf32, #tpu.memory_space<vmem>>, %arg4: memref<1x32x32xf32, #tpu.memory_space<vmem>>, %arg5: memref<1x1x32xf32, #tpu.memory_space<vmem>>, %arg6: memref<1x32x32xf32, #tpu.memory_space<vmem>>, %arg7: memref<1x1x32xf32, #tpu.memory_space<vmem>>, %arg8: memref<64x32xf32, #tpu.memory_space<vmem>>) attributes {dimension_semantics = [#tpu.dimension_semantics<parallel>], iteration_bounds = array<i64: 1>, scalar_prefetch = 0 : i64, scratch_operands = 0 : i64, tpu.core_type = #tpu.core_type<tc>, window_params = [{transform_indices = @transform_0, window_bounds = array<i64: 64, 226>}, {transform_indices = @transform_1, window_bounds = array<i64: 64, 32>}, {pipeline_mode = #tpu.pipeline_mode<synchronous>, transform_indices = @transform_2, window_bounds = array<i64: 1, 226, 32>}, {pipeline_mode = #tpu.pipeline_mode<synchronous>, transform_indices = @transform_3, window_bounds = array<i64: 1, 32, 32>}, {pipeline_mode = #tpu.pipeline_mode<synchronous>, transform_indices = @transform_4, window_bounds = array<i64: 1, 1, 32>}, {pipeline_mode = #tpu.pipeline_mode<synchronous>, transform_indices = @transform_5, window_bounds = array<i64: 1, 32, 32>}, {pipeline_mode = #tpu.pipeline_mode<synchronous>, transform_indices = @transform_6, window_bounds = array<i64: 1, 1, 32>}, {transform_indices = @transform_7, window_bounds = array<i64: 64, 32>}]} {
    %c0 = arith.constant 0 : index
    %c0_0 = arith.constant 0 : index
    %0 = vector.load %arg1[%c0, %c0_0] : memref<64x226xf32, #tpu.memory_space<vmem>>, vector<64x226xf32>
    %c0_1 = arith.constant 0 : index
    %c0_2 = arith.constant 0 : index
    %c0_3 = arith.constant 0 : index
    %1 = vector.load %arg3[%c0_1, %c0_2, %c0_3] : memref<1x226x32xf32, #tpu.memory_space<vmem>>, vector<1x226x32xf32>
    %2 = vector.shape_cast %1 : vector<1x226x32xf32> to vector<226x32xf32>
    %cst = arith.constant dense<0.000000e+00> : vector<64x32xf32>
    %3 = tpu.matmul %0, %2, %cst {dimension_numbers = #tpu.dot_dimension_numbers<[1], [0], [0], [1], [0, 0, 1, 1], [], []>} : vector<64x226xf32>, vector<226x32xf32>, vector<64x32xf32> -> vector<64x32xf32>
    %c0_4 = arith.constant 0 : index
    %c0_5 = arith.constant 0 : index
    %4 = vector.load %arg2[%c0_4, %c0_5] : memref<64x32xf32, #tpu.memory_space<vmem>>, vector<64x32xf32>
    %c0_6 = arith.constant 0 : index
    %c0_7 = arith.constant 0 : index
    %c0_8 = arith.constant 0 : index
    %5 = vector.load %arg4[%c0_6, %c0_7, %c0_8] : memref<1x32x32xf32, #tpu.memory_space<vmem>>, vector<1x32x32xf32>
    %6 = vector.shape_cast %5 : vector<1x32x32xf32> to vector<32x32xf32>
    %cst_9 = arith.constant dense<0.000000e+00> : vector<64x32xf32>
    %7 = tpu.matmul %4, %6, %cst_9 {dimension_numbers = #tpu.dot_dimension_numbers<[1], [0], [0], [1], [0, 0, 1, 1], [], []>} : vector<64x32xf32>, vector<32x32xf32>, vector<64x32xf32> -> vector<64x32xf32>
    %8 = arith.addf %3, %7 : vector<64x32xf32>
    %c0_10 = arith.constant 0 : index
    %c0_11 = arith.constant 0 : index
    %c0_12 = arith.constant 0 : index
    %9 = vector.load %arg5[%c0_10, %c0_11, %c0_12] : memref<1x1x32xf32, #tpu.memory_space<vmem>>, vector<1x1x32xf32>
    %10 = vector.shape_cast %9 : vector<1x1x32xf32> to vector<1x32xf32>
    %11 = vector.broadcast %10 : vector<1x32xf32> to vector<64x32xf32>
    %12 = arith.addf %8, %11 : vector<64x32xf32>
    %cst_13 = arith.constant 0.000000e+00 : f32
    %13 = vector.broadcast %cst_13 : f32 to vector<64x32xf32>
    %14 = arith.maximumf %12, %13 : vector<64x32xf32>
    %c0_14 = arith.constant 0 : index
    %c0_15 = arith.constant 0 : index
    %c0_16 = arith.constant 0 : index
    %15 = vector.load %arg6[%c0_14, %c0_15, %c0_16] : memref<1x32x32xf32, #tpu.memory_space<vmem>>, vector<1x32x32xf32>
    %16 = vector.shape_cast %15 : vector<1x32x32xf32> to vector<32x32xf32>
    %cst_17 = arith.constant dense<0.000000e+00> : vector<64x32xf32>
    %17 = tpu.matmul %14, %16, %cst_17 {dimension_numbers = #tpu.dot_dimension_numbers<[1], [0], [0], [1], [0, 0, 1, 1], [], []>} : vector<64x32xf32>, vector<32x32xf32>, vector<64x32xf32> -> vector<64x32xf32>
    %c0_18 = arith.constant 0 : index
    %c0_19 = arith.constant 0 : index
    %c0_20 = arith.constant 0 : index
    %18 = vector.load %arg7[%c0_18, %c0_19, %c0_20] : memref<1x1x32xf32, #tpu.memory_space<vmem>>, vector<1x1x32xf32>
    %19 = vector.shape_cast %18 : vector<1x1x32xf32> to vector<1x32xf32>
    %20 = vector.broadcast %19 : vector<1x32xf32> to vector<64x32xf32>
    %21 = arith.addf %17, %20 : vector<64x32xf32>
    %c0_21 = arith.constant 0 : index
    %c0_22 = arith.constant 0 : index
    %22 = vector.load %arg2[%c0_21, %c0_22] : memref<64x32xf32, #tpu.memory_space<vmem>>, vector<64x32xf32>
    %23 = arith.addf %21, %22 : vector<64x32xf32>
    %cst_23 = arith.constant 0.000000e+00 : f32
    %24 = vector.broadcast %cst_23 : f32 to vector<64x32xf32>
    %25 = arith.maximumf %23, %24 : vector<64x32xf32>
    %c0_24 = arith.constant 0 : index
    %c0_25 = arith.constant 0 : index
    %26 = vector.load %arg8[%c0_24, %c0_25] : memref<64x32xf32, #tpu.memory_space<vmem>>, vector<64x32xf32>
    tpu.vector_store %arg8[%c0_24, %c0_25], %25 {strides = array<i32>} : memref<64x32xf32, #tpu.memory_space<vmem>>, vector<64x32xf32>,
    return
  }
  func.func @transform_0(%arg0: i32) -> (i32, i32) {
    %c0_i32 = arith.constant 0 : i32
    %c0_i32_0 = arith.constant 0 : i32
    return %arg0, %c0_i32 : i32, i32
  }
  func.func @transform_1(%arg0: i32) -> (i32, i32) {
    %c0_i32 = arith.constant 0 : i32
    %c0_i32_0 = arith.constant 0 : i32
    return %arg0, %c0_i32 : i32, i32
  }
  func.func @transform_2(%arg0: i32) -> (i32, i32, i32) {
    %c0_i32 = arith.constant 0 : i32
    %c0_i32_0 = arith.constant 0 : i32
    %c0_i32_1 = arith.constant 0 : i32
    %c0_i32_2 = arith.constant 0 : i32
    return %c0_i32, %c0_i32_0, %c0_i32_1 : i32, i32, i32
  }
  func.func @transform_3(%arg0: i32) -> (i32, i32, i32) {
    %c0_i32 = arith.constant 0 : i32
    %c0_i32_0 = arith.constant 0 : i32
    %c0_i32_1 = arith.constant 0 : i32
    %c0_i32_2 = arith.constant 0 : i32
    return %c0_i32, %c0_i32_0, %c0_i32_1 : i32, i32, i32
  }
  func.func @transform_4(%arg0: i32) -> (i32, i32, i32) {
    %c0_i32 = arith.constant 0 : i32
    %c0_i32_0 = arith.constant 0 : i32
    %c0_i32_1 = arith.constant 0 : i32
    %c0_i32_2 = arith.constant 0 : i32
    return %c0_i32, %c0_i32_0, %c0_i32_1 : i32, i32, i32
  }
  func.func @transform_5(%arg0: i32) -> (i32, i32, i32) {
    %c0_i32 = arith.constant 0 : i32
    %c0_i32_0 = arith.constant 0 : i32
    %c0_i32_1 = arith.constant 0 : i32
    %c0_i32_2 = arith.constant 0 : i32
    return %c0_i32, %c0_i32_0, %c0_i32_1 : i32, i32, i32
  }
  func.func @transform_6(%arg0: i32) -> (i32, i32, i32) {
    %c0_i32 = arith.constant 0 : i32
    %c0_i32_0 = arith.constant 0 : i32
    %c0_i32_1 = arith.constant 0 : i32
    %c0_i32_2 = arith.constant 0 : i32
    return %c0_i32, %c0_i32_0, %c0_i32_1 : i32, i32, i32
  }
  func.func @transform_7(%arg0: i32) -> (i32, i32) {
    %c0_i32 = arith.constant 0 : i32
    %c0_i32_0 = arith.constant 0 : i32
    return %arg0, %c0_i32 : i32, i32
  }
}

</mosaic_0001>

<bundles_post_ra>
// kernel: tpu_custom_call.1
= control target key start
LH: loop header
LB: loop body
LE: loop exit
PB: predicated region body
PF: predicated region fallthrough
CT: control target
= control target key end

     0   :  { %v630_v0 = vmov 0.0   ;;  %vm83_vm0 = vcmask 261120   ;;  %vm213_vm1 = vcmask 801792   ;;  %vm238_vm2 = vcmask 1041408   ;;  %s977_s2 = inlined_call_operand.vmem [shape: f32[1,226,32], index: 2, kind: input, shape index: {}]   ;;  %s978_s3 = inlined_call_operand.vmem [shape: f32[1,32,32], index: 3, kind: input, shape index: {}]   ;;  %s979_s1 = inlined_call_operand.vmem [shape: f32[64,32], index: 1, kind: input, shape index: {}]   ;;  %s980_s0 = inlined_call_operand.vmem [shape: f32[64,226], index: 0, kind: input, shape index: {}]   ;;  %s981_s5 = inlined_call_operand.vmem [shape: f32[1,32,32], index: 5, kind: input, shape index: {}]   ;;  %s982_s4 = inlined_call_operand.vmem [shape: f32[1,1,32], index: 4, kind: input, shape index: {}]   ;;  %s983_s6 = inlined_call_operand.vmem [shape: f32[1,1,32], index: 6, kind: input, shape index: {}]   ;;  %s984_s7 = inlined_call_operand.vmem [shape: f32[64,32], index: 7, kind: output, shape index: {}]  }
   0x1   :  { %242 = vmatprep.subr.mxu1 %v630_v0  ;;  %v57_v1 = vld [vmem:[%s977_s2 + $0x78] sm:$0xff]  ;;  %v56_v2 = vld [vmem:[%s977_s2 + $0x70] sm:$0xff]  ;;  %v55_v3 = vld [vmem:[%s977_s2 + $0x68] sm:$0xff] }
   0x2   :  { %243 = vmatpush1.msra.mxu1 %v57_v1  ;;  %v54_v4 = vld [vmem:[%s977_s2 + $0x60] sm:$0xff]  ;;  %v53_v5 = vld [vmem:[%s977_s2 + $0x58] sm:$0xff]  ;;  %v52_v6 = vld [vmem:[%s977_s2 + $0x50] sm:$0xff] }
   0x3   :  { %244 = vmatprep.subr.mxu1 %v630_v0  ;;  %v82_v7 = vld [vmem:[%s978_s3 + $0x18] sm:$0xff]  ;;  %v81_v8 = vld [vmem:[%s978_s3 + $0x10] sm:$0xff]  ;;  %v51_v9 = vld [vmem:[%s977_s2 + $0x48] sm:$0xff] }
   0x4   :  { %245 = vmatpush1.msra.mxu1 %v56_v2  ;;  %589 = vmatprep.subr.mxu0 %v82_v7  ;;  %v80_v10 = vld [vmem:[%s978_s3 + $0x8] sm:$0xff]  ;;  %v50_v11 = vld [vmem:[%s977_s2 + $0x40] sm:$0xff]  ;;  %v49_v13 = vld [vmem:[%s977_s2 + $0x38] sm:$0xff] }
   0x5   :  { %246 = vmatprep.subr.mxu1 %v630_v0  ;;  %590 = vmatpush3.msra.mxu0 %v82_v7  ;;  %v79_v12 = vld [vmem:[%s978_s3] sm:$0xff]  ;;  %v726_v15 = vld [vmem:[%s979_s1 + $0x8] sm:$0xff]  ;;  %v48_v16 = vld [vmem:[%s977_s2 + $0x30] sm:$0xff] }
   0x6   :  { %247 = vmatpush1.msra.mxu1 %v55_v3  ;;  %591 = vmatprep.subr.mxu0 %v81_v8  ;;  %v721_v14 = vld [vmem:[%s979_s1] sm:$0xff]  ;;  %v27_v17 = vld [vmem:[%s980_s0 + $0x8] sm:$0xff]  ;;  %v740_v18 = vld [vmem:[%s979_s1 + $0x10] sm:$0xff] }
   0x7   :  { %248 = vmatprep.subr.mxu1 %v630_v0  ;;  %592 = vmatpush3.msra.mxu0 %v81_v8  ;;  %v47_v19 = vld [vmem:[%s977_s2 + $0x28] sm:$0xff]  ;;  %v752_v20 = vld [vmem:[%s979_s1 + $0x18] sm:$0xff]  ;;  %v46_v21 = vld [vmem:[%s977_s2 + $0x20] sm:$0xff] }
   0x8   :  { %249 = vmatpush1.msra.mxu1 %v54_v4  ;;  %593 = vmatprep.subr.mxu0 %v80_v10  ;;  %v763_v22 = vld [vmem:[%s979_s1 + $0x20] sm:$0xff]  ;;  %v45_v23 = vld [vmem:[%s977_s2 + $0x18] sm:$0xff]  ;;  %v776_v24 = vld [vmem:[%s979_s1 + $0x28] sm:$0xff] }
   0x9   :  { %250 = vmatprep.subr.mxu1 %v630_v0  ;;  %594 = vmatpush3.msra.mxu0 %v80_v10  ;;  %v44_v25 = vld [vmem:[%s977_s2 + $0x10] sm:$0xff]  ;;  %v43_v27 = vld [vmem:[%s977_s2 + $0x8] sm:$0xff]  ;;  %v798_v28 = vld [vmem:[%s979_s1 + $0x38] sm:$0xff] }
   0xa   :  { %251 = vmatpush1.msra.mxu1 %v53_v5  ;;  %595 = vmatprep.subr.mxu0 %v79_v12  ;;  %v785_v26 = vld [vmem:[%s979_s1 + $0x30] sm:$0xff]  ;;  %v42_v29 = vld [vmem:[%s977_s2] sm:$0xff]  ;;  %v69_v31 = vld [vmem:[%s977_s2 + $0xd8] sm:$0xff] }
   0xb   :  { %252 = vmatprep.subr.mxu1 %v630_v0  ;;  %596 = vmatpush3.msra.mxu0 %v79_v12  ;;  %v70_v30 = vld [vmem:[%s977_s2 + $0xe0] sm:$0x3]  ;;  %v68_v32 = vld [vmem:[%s977_s2 + $0xd0] sm:$0xff]  ;;  %v67_v33 = vld [vmem:[%s977_s2 + $0xc8] sm:$0xff] }
   0xc   :  { %253 = vmatpush1.msra.mxu1 %v52_v6  ;;  %597 = vmatprep.mubr.msk.f32.mxu0 %vm83_vm0, %v721_v14  ;;  %v66_v34 = vld [vmem:[%s977_s2 + $0xc0] sm:$0xff]  ;;  %v65_v35 = vld [vmem:[%s977_s2 + $0xb8] sm:$0xff]  ;;  %v64_v36 = vld [vmem:[%s977_s2 + $0xb0] sm:$0xff] }
   0xd   :  { %254 = vmatprep.subr.mxu1 %v630_v0  ;;  %598 = vmatmul.mubr.msk.f32.vlgmr.msra.gmra.mxu0 %vm83_vm0, %v726_v15  ;;  %v63_v37 = vld [vmem:[%s977_s2 + $0xa8] sm:$0xff]  ;;  %v62_v38 = vld [vmem:[%s977_s2 + $0xa0] sm:$0xff]  ;;  %v61_v39 = vld [vmem:[%s977_s2 + $0x98] sm:$0xff] }
   0xe   :  { %255 = vmatpush1.msra.mxu1 %v51_v9  ;;  %547 = vmatprep.mubr.msk.f32.mxu1 %vm213_vm1, %v27_v17  ;;  %v60_v40 = vld [vmem:[%s977_s2 + $0x90] sm:$0xff]  ;;  %v59_v41 = vld [vmem:[%s977_s2 + $0x88] sm:$0xff]  ;;  %v58_v42 = vld [vmem:[%s977_s2 + $0x80] sm:$0xff] }
   0xf   :  { %256 = vmatprep.subr.mxu1 %v630_v0  ;;  %600 = vmatprep.mubr.msk.f32.mxu0 %vm83_vm0, %v740_v18  ;;  %v26_v43 = vld [vmem:[%s980_s0] sm:$0xff]  ;;  %v29_v44 = vld [vmem:[%s980_s0 + $0x18] sm:$0xff]  ;;  %v28_v45 = vld [vmem:[%s980_s0 + $0x10] sm:$0xff] }
  0x10   :  { %257 = vmatpush1.msra.mxu1 %v50_v11  ;;  %v31_v46 = vld [vmem:[%s980_s0 + $0x28] sm:$0xff]  ;;  %v30_v47 = vld [vmem:[%s980_s0 + $0x20] sm:$0xff]  ;;  %v33_v48 = vld [vmem:[%s980_s0 + $0x38] sm:$0xff] }
  0x11   :  { %258 = vmatprep.subr.mxu1 %v630_v0  ;;  %601 = vmatmul.mubr.msk.f32.gmra.mxu0 %vm83_vm0, %v752_v20  ;;  %v32_v49 = vld [vmem:[%s980_s0 + $0x30] sm:$0xff]  ;;  %v35_v50 = vld [vmem:[%s980_s0 + $0x48] sm:$0xff]  ;;  %v34_v51 = vld [vmem:[%s980_s0 + $0x40] sm:$0xff] }
  0x12   :  { %259 = vmatpush1.msra.mxu1 %v49_v13  ;;  %603 = vmatprep.mubr.msk.f32.mxu0 %vm83_vm0, %v763_v22  ;;  %v37_v52 = vld [vmem:[%s980_s0 + $0x58] sm:$0xff]  ;;  %v36_v53 = vld [vmem:[%s980_s0 + $0x50] sm:$0xff]  ;;  %v39_v54 = vld [vmem:[%s980_s0 + $0x68] sm:$0xff] }
  0x13   :  { %260 = vmatprep.subr.mxu1 %v630_v0  ;;  %v38_v55 = vld [vmem:[%s980_s0 + $0x60] sm:$0xff]  ;;  %v41_v56 = vld [vmem:[%s980_s0 + $0x78] sm:$0xff]  ;;  %v40_v57 = vld [vmem:[%s980_s0 + $0x70] sm:$0xff] }
  0x14   :  { %261 = vmatpush1.msra.mxu1 %v48_v16  ;;  %v373_v58 = vld [vmem:[%s981_s5 + $0x18] sm:$0xff]  ;;  %v372_v59 = vld [vmem:[%s981_s5 + $0x10] sm:$0xff]  ;;  %v371_v60 = vld [vmem:[%s981_s5 + $0x8] sm:$0xff] }
  0x15   :  { %262 = vmatprep.subr.mxu1 %v630_v0  ;;  %604 = vmatmul.mubr.msk.f32.gmra.mxu0 %vm83_vm0, %v776_v24  ;;  %v370_v61 = vld [vmem:[%s981_s5] sm:$0xff] }
  0x16   :  { %263 = vmatpush1.msra.mxu1 %v47_v19  ;;  %606 = vmatprep.mubr.msk.f32.mxu0 %vm83_vm0, %v785_v26  ;;  %v555_v1 = vld [vmem:[%s982_s4] ss:$0 sm:$0xff] }
  0x17   :  { %264 = vmatprep.subr.mxu1 %v630_v0  ;;  %609 = vmatprep.subr.mxu0 %v373_v58 }
  0x18   :  { %265 = vmatpush1.msra.mxu1 %v46_v21  ;;  %610 = vmatpush3.msra.mxu0 %v373_v58 }
  0x19   :  { %266 = vmatprep.subr.mxu1 %v630_v0  ;;  %607 = vmatmul.mubr.msk.f32.gmra.mxu0 %vm83_vm0, %v798_v28 }
  0x1a   :  { %267 = vmatpush1.msra.mxu1 %v45_v23  ;;  %611 = vmatprep.subr.mxu0 %v372_v59 }
  0x1b   :  { %268 = vmatprep.subr.mxu1 %v630_v0  ;;  %612 = vmatpush3.msra.mxu0 %v372_v59 }
  0x1c   :  { %269 = vmatpush1.msra.mxu1 %v44_v25  ;;  %613 = vmatprep.subr.mxu0 %v371_v60 }
  0x1d   :  { %270 = vmatprep.subr.mxu1 %v630_v0  ;;  %614 = vmatpush3.msra.mxu0 %v371_v60 }
  0x1e   :  { %271 = vmatpush1.msra.mxu1 %v43_v27  ;;  %615 = vmatprep.subr.mxu0 %v370_v61 }
  0x1f   :  { %272 = vmatprep.subr.mxu1 %v630_v0  ;;  %616 = vmatpush3.msra.mxu0 %v370_v61 }
  0x20   :  { %273 = vmatpush1.msra.mxu1 %v42_v29 }
  0x21   :  { %280 = vmatprep.subr.mxu1 %v630_v0 }
  0x22   :  { %546 = vmatpush2.msk.msra.mxu1 %vm238_vm2, %v70_v30 }
  0x23   :  { %282 = vmatprep.subr.mxu1 %v630_v0 }
  0x24   :  { %283 = vmatpush2.msra.mxu1 %v69_v31 }
  0x25   :  { %284 = vmatprep.subr.mxu1 %v630_v0 }
  0x26   :  { %285 = vmatpush2.msra.mxu1 %v68_v32 }
  0x27   :  { %286 = vmatprep.subr.mxu1 %v630_v0 }
  0x28   :  { %287 = vmatpush2.msra.mxu1 %v67_v33 }
  0x29   :  { %288 = vmatprep.subr.mxu1 %v630_v0 }
  0x2a   :  { %289 = vmatpush2.msra.mxu1 %v66_v34 }
  0x2b   :  { %290 = vmatprep.subr.mxu1 %v630_v0 }
  0x2c   :  { %291 = vmatpush2.msra.mxu1 %v65_v35 }
  0x2d   :  { %292 = vmatprep.subr.mxu1 %v630_v0 }
  0x2e   :  { %293 = vmatpush2.msra.mxu1 %v64_v36 }
  0x2f   :  { %294 = vmatprep.subr.mxu1 %v630_v0 }
  0x30   :  { %295 = vmatpush2.msra.mxu1 %v63_v37 }
  0x31   :  { %296 = vmatprep.subr.mxu1 %v630_v0 }
  0x32   :  { %297 = vmatpush2.msra.mxu1 %v62_v38 }
  0x33   :  { %298 = vmatprep.subr.mxu1 %v630_v0 }
  0x34   :  { %299 = vmatpush2.msra.mxu1 %v61_v39 }
  0x35   :  { %300 = vmatprep.subr.mxu1 %v630_v0 }
  0x36   :  { %301 = vmatpush2.msra.mxu1 %v60_v40 }
  0x37   :  { %302 = vmatprep.subr.mxu1 %v630_v0 }
  0x38   :  { %303 = vmatpush2.msra.mxu1 %v59_v41 }
  0x39   :  { %304 = vmatprep.subr.mxu1 %v630_v0 }
  0x3a   :  { %305 = vmatpush2.msra.mxu1 %v58_v42 }
  0x3b   :  { %307 = vmatmul.mubr.f32.vlgmr.msra.gmra.mxu1 %v26_v43 }
  0x3c   :  { %548 = vmatprep.mubr.msk.f32.mxu1 %vm213_vm1, %v29_v44 }
  0x3f   :  { %312 = vmatmul.mubr.f32.gmra.mxu1 %v28_v45 }
  0x40   :  { %549 = vmatprep.mubr.msk.f32.mxu1 %vm213_vm1, %v31_v46 }
  0x43   :  { %317 = vmatmul.mubr.f32.gmra.mxu1 %v30_v47 }
  0x44   :  { %550 = vmatprep.mubr.msk.f32.mxu1 %vm213_vm1, %v33_v48 }
  0x47   :  { %322 = vmatmul.mubr.f32.gmra.mxu1 %v32_v49 }
  0x48   :  { %551 = vmatprep.mubr.msk.f32.mxu1 %vm213_vm1, %v35_v50 }
  0x4b   :  { %327 = vmatmul.mubr.f32.gmra.mxu1 %v34_v51 }
  0x4c   :  { %552 = vmatprep.mubr.msk.f32.mxu1 %vm213_vm1, %v37_v52 }
  0x4f   :  { %332 = vmatmul.mubr.f32.gmra.mxu1 %v36_v53 }
  0x50   :  { %553 = vmatprep.mubr.msk.f32.mxu1 %vm213_vm1, %v39_v54 }
  0x53   :  { %337 = vmatmul.mubr.f32.gmra.mxu1 %v38_v55  ;;  %v556_v55 = vld [vmem:[%s983_s6] ss:$0 sm:$0xff] }
  0x54   :  { %554 = vmatprep.mubr.msk.f32.mxu1 %vm213_vm1, %v41_v56 }
  0x57   :  { %342 = vmatmul.mubr.f32.gmra.mxu1 %v40_v57 }
  0xcd   :  { %v599_v62 = vpop.f32.mrf.mxu0 }
  0xcf   :  { %v174_v63 = vpop.f32.mrf.mxu0 }
  0xd1   :  { %v602_v4 = vpop.f32.mrf.mxu0 }
  0xd3   :  { %v184_v10 = vpop.f32.mrf.mxu0 }
  0xd5   :  { %v605_v19 = vpop.f32.mrf.mxu0 }
  0xd7   :  { %v194_v30 = vpop.f32.mrf.mxu0 }
  0xd9   :  { %v608_v36 = vpop.f32.mrf.mxu0 }
  0xdb   :  { %v204_v42 = vpop.f32.mrf.mxu0 }
  0xfb   :  { %v308_v0 = vpop.f32.mrf.mxu1 }
  0xfc   :  { %v309_v2 = vadd.f32 %v308_v0, %v174_v63 }
  0xfd   :  { %v310_v3 = vpop.f32.mrf.mxu1 }
  0xfe   :  { %v354_v5 = vadd.f32 %v555_v1, %v309_v2 }
  0xff   :  { %v313_v6 = vpop.f32.mrf.mxu1 }
 0x100   :  { %v362_v7 = vmax.f32 %v354_v5, 0.0  ;;  %v314_v8 = vadd.f32 %v599_v62, %v313_v6 }
 0x101   :  { %v315_v9 = vpop.f32.mrf.mxu1 }
 0x102   :  { %v355_v11 = vadd.f32 %v555_v1, %v314_v8  ;;  %617 = vmatprep.mubr.msk.f32.mxu0 %vm83_vm0, %v362_v7 }
 0x103   :  { %v318_v12 = vpop.f32.mrf.mxu1 }
 0x104   :  { %v363_v13 = vmax.f32 %v355_v11, 0.0  ;;  %v319_v16 = vadd.f32 %v318_v12, %v184_v10 }
 0x105   :  { %v320_v17 = vpop.f32.mrf.mxu1 }
 0x106   :  { %v356_v21 = vadd.f32 %v555_v1, %v319_v16  ;;  %618 = vmatmul.mubr.msk.f32.vlgmr.msra.gmra.mxu0 %vm83_vm0, %v363_v13 }
 0x107   :  { %v323_v23 = vpop.f32.mrf.mxu1 }
 0x108   :  { %v364_v25 = vmax.f32 %v356_v21, 0.0  ;;  %v324_v27 = vadd.f32 %v602_v4, %v323_v23 }
 0x109   :  { %v325_v29 = vpop.f32.mrf.mxu1 }
 0x10a   :  { %v357_v31 = vadd.f32 %v555_v1, %v324_v27  ;;  %620 = vmatprep.mubr.msk.f32.mxu0 %vm83_vm0, %v364_v25 }
 0x10b   :  { %v328_v32 = vpop.f32.mrf.mxu1 }
 0x10c   :  { %v365_v33 = vmax.f32 %v357_v31, 0.0  ;;  %v329_v34 = vadd.f32 %v328_v32, %v194_v30 }
 0x10d   :  { %v330_v35 = vpop.f32.mrf.mxu1 }
 0x10e   :  { %v358_v37 = vadd.f32 %v555_v1, %v329_v34  ;;  %621 = vmatmul.mubr.msk.f32.gmra.mxu0 %vm83_vm0, %v365_v33 }
 0x10f   :  { %v333_v38 = vpop.f32.mrf.mxu1 }
 0x110   :  { %v366_v39 = vmax.f32 %v358_v37, 0.0  ;;  %v334_v40 = vadd.f32 %v605_v19, %v333_v38 }
 0x111   :  { %v335_v41 = vpop.f32.mrf.mxu1 }
 0x112   :  { %v359_v43 = vadd.f32 %v555_v1, %v334_v40  ;;  %623 = vmatprep.mubr.msk.f32.mxu0 %vm83_vm0, %v366_v39 }
 0x113   :  { %v338_v44 = vpop.f32.mrf.mxu1 }
 0x114   :  { %v367_v45 = vmax.f32 %v359_v43, 0.0  ;;  %v339_v46 = vadd.f32 %v338_v44, %v204_v42 }
 0x115   :  { %v340_v47 = vpop.f32.mrf.mxu1 }
 0x116   :  { %v360_v48 = vadd.f32 %v555_v1, %v339_v46  ;;  %624 = vmatmul.mubr.msk.f32.gmra.mxu0 %vm83_vm0, %v367_v45 }
 0x117   :  { %v343_v49 = vpop.f32.mrf.mxu1 }
 0x118   :  { %v368_v50 = vmax.f32 %v360_v48, 0.0  ;;  %v344_v51 = vadd.f32 %v608_v36, %v343_v49 }
 0x119   :  { %v345_v52 = vpop.f32.mrf.mxu1 }
 0x11a   :  { %v361_v53 = vadd.f32 %v555_v1, %v344_v51  ;;  %626 = vmatprep.mubr.msk.f32.mxu0 %vm83_vm0, %v368_v50 }
 0x11c   :  { %v369_v54 = vmax.f32 %v361_v53, 0.0 }
 0x11e   :  { %627 = vmatmul.mubr.msk.f32.gmra.mxu0 %vm83_vm0, %v369_v54 }
 0x1c6   :  { %v619_v56 = vpop.f32.mrf.mxu0 }
 0x1c7   :  { %v477_v57 = vadd.f32 %v619_v56, %v556_v55 }
 0x1c8   :  { %v471_v58 = vpop.f32.mrf.mxu0 }
 0x1c9   :  { %v511_v59 = vadd.f32 %v477_v57, %v726_v15  ;;  %v472_v60 = vadd.f32 %v556_v55, %v471_v58 }
 0x1cb   :  { %v519_v61 = vmax.f32 %v511_v59, 0.0  ;;  %v510_v62 = vadd.f32 %v472_v60, %v721_v14 }
 0x1cd   :  { %527 = vst.msk [vmem:[%s984_s7 + $0x8] sm:$0xff] %vm83_vm0, %v519_v61  ;;  %v518_v63 = vmax.f32 %v510_v62, 0.0 }
 0x1ce   :  { %v622_v0 = vpop.f32.mrf.mxu0 }
 0x1cf   :  { %526 = vst.msk [vmem:[%s984_s7] sm:$0xff] %vm83_vm0, %v518_v63  ;;  %v487_v1 = vadd.f32 %v622_v0, %v556_v55 }
 0x1d0   :  { %v481_v2 = vpop.f32.mrf.mxu0 }
 0x1d1   :  { %v513_v15 = vadd.f32 %v487_v1, %v752_v20  ;;  %v482_v3 = vadd.f32 %v556_v55, %v481_v2 }
 0x1d3   :  { %v521_v4 = vmax.f32 %v513_v15, 0.0  ;;  %v512_v14 = vadd.f32 %v482_v3, %v740_v18 }
 0x1d5   :  { %529 = vst.msk [vmem:[%s984_s7 + $0x18] sm:$0xff] %vm83_vm0, %v521_v4  ;;  %v520_v5 = vmax.f32 %v512_v14, 0.0 }
 0x1d6   :  { %v625_v6 = vpop.f32.mrf.mxu0 }
 0x1d7   :  { %528 = vst.msk [vmem:[%s984_s7 + $0x10] sm:$0xff] %vm83_vm0, %v520_v5  ;;  %v497_v7 = vadd.f32 %v625_v6, %v556_v55 }
 0x1d8   :  { %v491_v8 = vpop.f32.mrf.mxu0 }
 0x1d9   :  { %v515_v20 = vadd.f32 %v497_v7, %v776_v24  ;;  %v492_v9 = vadd.f32 %v556_v55, %v491_v8 }
 0x1db   :  { %v523_v10 = vmax.f32 %v515_v20, 0.0  ;;  %v514_v18 = vadd.f32 %v492_v9, %v763_v22 }
 0x1dd   :  { %531 = vst.msk [vmem:[%s984_s7 + $0x28] sm:$0xff] %vm83_vm0, %v523_v10  ;;  %v522_v11 = vmax.f32 %v514_v18, 0.0 }
 0x1de   :  { %v628_v12 = vpop.f32.mrf.mxu0 }
 0x1df   :  { %530 = vst.msk [vmem:[%s984_s7 + $0x20] sm:$0xff] %vm83_vm0, %v522_v11  ;;  %v507_v13 = vadd.f32 %v628_v12, %v556_v55 }
 0x1e0   :  { %v501_v16 = vpop.f32.mrf.mxu0 }
 0x1e1   :  { %v517_v24 = vadd.f32 %v507_v13, %v798_v28  ;;  %v502_v17 = vadd.f32 %v556_v55, %v501_v16 }
 0x1e3   :  { %v525_v19 = vmax.f32 %v517_v24, 0.0  ;;  %v516_v22 = vadd.f32 %v502_v17, %v785_v26 }
 0x1e5   :  { %533 = vst.msk [vmem:[%s984_s7 + $0x38] sm:$0xff] %vm83_vm0, %v525_v19  ;;  %v524_v21 = vmax.f32 %v516_v22, 0.0 }
 0x1e7   :  { %532 = vst.msk [vmem:[%s984_s7 + $0x30] sm:$0xff] %vm83_vm0, %v524_v21 }

</bundles_post_ra>
